<compile_context>
chip_gen: v5e
topology: v5e:2x2
jax: 0.10.0
libtpu: 0.0.40
codegen_flags: <defaults>
</compile_context>

<pallas_src>
import math

import jax
import jax.numpy as jnp
from jax.experimental import pallas as pl
from jax.experimental.pallas import tpu as pltpu


def _copy_listener_kernel(feats_ref, v_ref, out_ref):
    # feats_ref : (block_b, n_obj, d_in)  -- raw flattened features
    # v_ref     : (block_b, d_in)         -- folded (bilinear o feat_model) vector
    # out_ref   : (block_b, n_obj)        -- scores
    feats = feats_ref[...].astype(jnp.float32)
    v = v_ref[...].astype(jnp.float32)
    # scores[b, j] = sum_d feats[b, j, d] * v[b, d]
    # VPU multiply with sublane broadcast over n_obj + XLU lane reduce.
    prod = feats * v[:, None, :]
    out_ref[...] = jnp.sum(prod, axis=-1).astype(out_ref.dtype)


def _choose_block_b(batch, n_obj, d_in, itemsize):
    """Pick a batch block so block_b * n_obj lands near a few hundred rows while
    one pipeline buffer of feats stays ~<=4 MiB (fits default scoped VMEM on
    v5e/v6e/v7x with double buffering and headroom)."""
    target_rows = 512
    per_b_bytes = max(1, n_obj * d_in * itemsize)
    feats_buf_budget = 4 << 20                     # per buffer; x2 for double-buffering
    blk = min(max(1, target_rows // max(1, n_obj)),
              max(1, feats_buf_budget // per_b_bytes))
    if blk >= batch:
        return batch                               # single block == full batch dim
    # sub-batch blocks must be a multiple of 8 (sublane dim of the 2-D v/out blocks)
    return max(8, (blk // 8) * 8)


def copy_listener_forward(feats, message, w_feat, w_bilinear, *, block_b=None):
    """feats: (B, n_obj, *obj_dims); message: (B, message_size).
    w_feat: (feat_size, d_in), w_bilinear: (feat_size, message_size)  (nn.Linear layout)."""
    B, n_obj = feats.shape[0], feats.shape[1]
    d_in = math.prod(feats.shape[2:])

    # Native dtype, no extra HBM pass for an astype; only a metadata reshape.
    feats_flat = feats.reshape(B, n_obj, d_in)

    # Hoisted bilinear + reassociation (tiny XLA matmuls, once per batch):
    #   v[b] = (message[b] @ W_bil^T) @ W_feat          -> (B, d_in)
    msg_enc = jnp.dot(message, w_bilinear.T, preferred_element_type=jnp.float32)
    v = jnp.dot(msg_enc, w_feat, preferred_element_type=jnp.float32)

    if block_b is None:
        block_b = _choose_block_b(B, n_obj, d_in, feats_flat.dtype.itemsize)
    block_b = int(min(block_b, B)) if block_b >= B else int(block_b)

    b_pad = pl.cdiv(B, block_b) * block_b
    if b_pad != B:
        feats_flat = jnp.pad(feats_flat, ((0, b_pad - B), (0, 0), (0, 0)))
        v = jnp.pad(v, ((0, b_pad - B), (0, 0)))

    grid = (b_pad // block_b,)

    # Explicit VMEM budget (double-buffered blocks + headroom), capped well under
    # v7x's 64 MiB physical / 32 MiB default-scoped per-core VMEM.
    feats_blk_bytes = block_b * n_obj * d_in * feats_flat.dtype.itemsize
    v_blk_bytes = block_b * d_in * 4
    out_blk_bytes = block_b * n_obj * 4
    vmem_limit = 2 * (feats_blk_bytes + v_blk_bytes + out_blk_bytes) + (2 << 20)
    vmem_limit = int(min(max(vmem_limit, 4 << 20), 32 << 20))

    # TODO(synk): for extremely large d_in a further 'arbitrary' reduction axis
    # over d_in (with a VMEM f32 accumulator) would bound VMEM; not needed here.
    scores = pl.pallas_call(
        _copy_listener_kernel,
        out_shape=jax.ShapeDtypeStruct((b_pad, n_obj), jnp.float32),
        grid_spec=pltpu.PrefetchScalarGridSpec(
            num_scalar_prefetch=0,
            grid=grid,
            in_specs=[
                pl.BlockSpec((block_b, n_obj, d_in), lambda i: (i, 0, 0)),
                pl.BlockSpec((block_b, d_in), lambda i: (i, 0)),
            ],
            out_specs=pl.BlockSpec((block_b, n_obj), lambda i: (i, 0)),
        ),
        compiler_params=pltpu.CompilerParams(
            dimension_semantics=("parallel",),
            vmem_limit_bytes=vmem_limit,
        ),
    )(feats_flat, v)

    return scores[:B]


def _reference_forward(feats, message, w_feat, w_bilinear):
    B, n_obj = feats.shape[0], feats.shape[1]
    feats_flat = feats.reshape(B * n_obj, -1).astype(jnp.float32)
    emb = feats_flat @ w_feat.T                     # feat_model
    emb = emb.reshape(B, n_obj, -1)                 # (B, n_obj, feat_size)
    msg_enc = message @ w_bilinear.T                # (B, feat_size)
    return jnp.einsum('ijh,ih->ij', emb, msg_enc)   # (B, n_obj)


if __name__ == "__main__":
    B, N_OBJ, C, H, W = 2, 8, 4, 8, 8
    D_IN = C * H * W            # 256
    FEAT_SIZE = 32              # feat_model.final_feat_dim
    MESSAGE_SIZE = 16

    key = jax.random.PRNGKey(0)
    k_feats, k_msg, k_wf, k_wb = jax.random.split(key, 4)

    feats = jax.random.normal(k_feats, (B, N_OBJ, C, H, W), dtype=jnp.float32)
    message = jax.random.normal(k_msg, (B, MESSAGE_SIZE), dtype=jnp.float32)

    # nn.Linear-style init: U(-1/sqrt(fan_in), 1/sqrt(fan_in)), weight (out, in)
    bound_f = 1.0 / (D_IN ** 0.5)
    bound_b = 1.0 / (MESSAGE_SIZE ** 0.5)
    w_feat = jax.random.uniform(k_wf, (FEAT_SIZE, D_IN),
                                minval=-bound_f, maxval=bound_f, dtype=jnp.float32)
    w_bilinear = jax.random.uniform(k_wb, (FEAT_SIZE, MESSAGE_SIZE),
                                    minval=-bound_b, maxval=bound_b, dtype=jnp.float32)

    out = copy_listener_forward(feats, message, w_feat, w_bilinear)
    out = jax.block_until_ready(out)

    ref = _reference_forward(feats, message, w_feat, w_bilinear)
    assert out.shape == (B, N_OBJ)
    assert jnp.allclose(out, ref, atol=1e-4, rtol=1e-4), "mismatch vs reference"
    print("KERNEL_OK")
</pallas_src>

<mosaic_0001>
module attributes {stable_mosaic.version = 11 : i64} {
  func.func @_copy_listener_kernel(%arg0: i32, %arg1: memref<2x8x256xf32, #tpu.memory_space<vmem>>, %arg2: memref<2x256xf32, #tpu.memory_space<vmem>>, %arg3: memref<2x8xf32, #tpu.memory_space<vmem>>) attributes {dimension_semantics = [#tpu.dimension_semantics<parallel>], iteration_bounds = array<i64: 1>, scalar_prefetch = 0 : i64, scratch_operands = 0 : i64, tpu.core_type = #tpu.core_type<tc>, window_params = [{transform_indices = @transform_0, window_bounds = array<i64: 2, 8, 256>}, {transform_indices = @transform_1, window_bounds = array<i64: 2, 256>}, {transform_indices = @transform_2, window_bounds = array<i64: 2, 8>}]} {
    %c0 = arith.constant 0 : index
    %c0_0 = arith.constant 0 : index
    %c0_1 = arith.constant 0 : index
    %0 = vector.load %arg1[%c0, %c0_0, %c0_1] : memref<2x8x256xf32, #tpu.memory_space<vmem>>, vector<2x8x256xf32>
    %c0_2 = arith.constant 0 : index
    %c0_3 = arith.constant 0 : index
    %1 = vector.load %arg2[%c0_2, %c0_3] : memref<2x256xf32, #tpu.memory_space<vmem>>, vector<2x256xf32>
    %2 = vector.shape_cast %1 : vector<2x256xf32> to vector<2x1x256xf32>
    %3 = vector.broadcast %2 : vector<2x1x256xf32> to vector<2x8x256xf32>
    %4 = arith.mulf %0, %3 : vector<2x8x256xf32>
    %cst = arith.constant dense<0.000000e+00> : vector<2x8xf32>
    %5 = vector.multi_reduction <add>, %4, %cst [2] : vector<2x8x256xf32> to vector<2x8xf32>
    %c0_4 = arith.constant 0 : index
    %c0_5 = arith.constant 0 : index
    %6 = vector.load %arg3[%c0_4, %c0_5] : memref<2x8xf32, #tpu.memory_space<vmem>>, vector<2x8xf32>
    tpu.vector_store %arg3[%c0_4, %c0_5], %5 {strides = array<i32>} : memref<2x8xf32, #tpu.memory_space<vmem>>, vector<2x8xf32>,
    return
  }
  func.func @transform_0(%arg0: i32) -> (i32, i32, i32) {
    %c0_i32 = arith.constant 0 : i32
    %c0_i32_0 = arith.constant 0 : i32
    %c0_i32_1 = arith.constant 0 : i32
    return %arg0, %c0_i32, %c0_i32_0 : i32, i32, i32
  }
  func.func @transform_1(%arg0: i32) -> (i32, i32) {
    %c0_i32 = arith.constant 0 : i32
    %c0_i32_0 = arith.constant 0 : i32
    return %arg0, %c0_i32 : i32, i32
  }
  func.func @transform_2(%arg0: i32) -> (i32, i32) {
    %c0_i32 = arith.constant 0 : i32
    %c0_i32_0 = arith.constant 0 : i32
    return %arg0, %c0_i32 : i32, i32
  }
}

</mosaic_0001>

<bundles_post_ra>
// kernel: tpu_custom_call.1
= control target key start
LH: loop header
LB: loop body
LE: loop exit
PB: predicated region body
PF: predicated region fallthrough
CT: control target
= control target key end

     0   :  { %7 = vsyncpa [#allocation3], 0  ;;  %s224_s0 = inlined_call_operand.hbm [shape: f32[2,8,256], index: 0, kind: input, shape index: {}]   ;;  %s225_s1 = inlined_call_operand.hbm [shape: f32[2,256], index: 1, kind: input, shape index: {}]   ;;  %s226_s2 = inlined_call_operand.hbm [shape: f32[2,8], index: 2, kind: output, shape index: {}]  }
   0x1   :  { %8 = vsyncpa [#allocation6], 0 }
   0x2   :  { %9 = vsyncpa [#allocation4], 0  ;;  %s14_s11 = sshll.u32 %s224_s0, 4  ;;  %s193_s12 = smov [#allocation2]   ;;  %s15_s11 = int_to_ptr.hbm [resolvable:$true] %s14_s11 }
   0x3   :  { %s16_s13 = sshll.u32 %s193_s12, 4  ;;  %s28_s16 = sshll.u32 %s225_s1, 4  ;;  %s17_s13 = int_to_ptr.vmem [resolvable:$true] %s16_s13  ;;  %s29_s16 = int_to_ptr.hbm [resolvable:$true] %s28_s16 }
   0x4   :  { %s194_s17 = smov 256   ;;  %s195_s18 = smov 16  }
   0x5   :  { %22 = dma.hbm_to_vmem [thread:$0]  %s15_s11, 512, %s17_s13, [#allocation3], %s194_s17, %s194_s17, %s195_s18  }
   0x6   :  { %s196_s19 = smov [#allocation5]  }
   0x7   :  { %s30_s20 = sshll.u32 %s196_s19, 4  ;;  %s31_s20 = int_to_ptr.vmem [resolvable:$true] %s30_s20 }
   0x8   :  { %33 = dma.hbm_to_vmem [thread:$0]  %s29_s16, 64, %s31_s20, [#allocation6]  }
   0x9   :  { %187 = dma.done.wait [#allocation3], 512  }
   0xa   :  { %188 = vsyncadd [#allocation3], 4294966784 }
   0xb   :  { %189 = dma.done.wait [#allocation6], 64  }
   0xc   :  { %190 = vsyncadd [#allocation6], 4294967232  ;;  %vm51_vm0 = vcmask 1040384   ;;  %v46_v0 = vld [vmem:[#allocation5] sm:$0xf]  ;;  %vm53_vm1 = vcmask 1042434   ;;  %v84_v26 = vlaneseq }
   0xd   :  { %vm55_vm2 = vcmask 1041408   ;;  %vm57_vm3 = vcmask 1041409   ;;  %vm59_vm4 = vcmask 1043459   ;;  %v48_v1 = vrot.slane %v46_v0, 1  ;;  %v42_v8 = vld [vmem:[#allocation2] sm:$0xff]  ;;  %v43_v9 = vld [vmem:[#allocation2 + $0x8] sm:$0xff] }
   0xe   :  { %v49_v2 = vrot.slane %v46_v0, 2  ;;  %v50_v3 = vrot.slane %v46_v0, 3  ;;  %vm61_vm5 = vcmask 1042433   ;;  %v44_v19 = vld [vmem:[#allocation2 + $0x10] sm:$0xff]  ;;  %v45_v20 = vld [vmem:[#allocation2 + $0x18] sm:$0xff]  ;;  %v85_v27 = vand.u32 127, %v84_v26 }
   0xf   :  { %v52_v4 = vsel %vm51_vm0, %v46_v0, %v48_v1  ;;  %v58_v6 = vsel %vm57_vm3, %v46_v0, %v48_v1  ;;  %s197_s0 = smov [#allocation7]   ;;  %s99_s23 = sshll.u32 %s226_s2, 4  ;;  %vm90_vm6 = vcmask 58368   ;;  %s100_s23 = int_to_ptr.hbm [resolvable:$true] %s99_s23 }
  0x10   :  { %v54_v5 = vsel %vm53_vm1, %v49_v2, %v50_v3  ;;  %v60_v7 = vsel %vm59_vm4, %v49_v2, %v50_v3  ;;  %s97_s1 = sshll.u32 %s197_s0, 4  ;;  %s98_s1 = int_to_ptr.vmem [resolvable:$true] %s97_s1 }
  0x11   :  { %v56_v10 = vsel %vm55_vm2, %v52_v4, %v54_v5  ;;  %v62_v11 = vsel %vm61_vm5, %v58_v6, %v60_v7 }
  0x12   :  { %v64_v12 = vperm.slane %v56_v10, 0  ;;  %v65_v13 = vperm.slane %v56_v10, 1  ;;  %v63_v14 = vrot.slane %v62_v11, 1 }
  0x14   :  { %v72_v15 = vmul.f32 %v64_v12, %v42_v8  ;;  %v73_v16 = vmul.f32 %v65_v13, %v43_v9  ;;  %v66_v17 = vperm.slane %v63_v14, 0  ;;  %v67_v18 = vperm.slane %v63_v14, 1 }
  0x16   :  { %v76_v21 = vadd.f32 %v73_v16, %v72_v15  ;;  %v74_v22 = vmul.f32 %v66_v17, %v44_v19  ;;  %v75_v23 = vmul.f32 %v67_v18, %v45_v20 }
  0x18   :  { %77 = vadd.xlane.f32.xlu0 %v76_v21  ;;  %v79_v24 = vadd.f32 %v75_v23, %v74_v22 }
  0x20   :  { %80 = vadd.xlane.f32.xlu0 %v79_v24 }
  0x8b   :  { %v78_v25 = vpop.xlane.xlu0 %77 }
  0x8c   :  { %v86_v29 = vperm.slane %v78_v25, %v85_v27 }
  0x93   :  { %v81_v28 = vpop.xlane.xlu0 %80 }
  0x94   :  { %v87_v30 = vperm.slane %v81_v28, %v85_v27 }
  0x96   :  { %v88_v31 = vsel %vm57_vm3, %v87_v30, %v86_v29 }
  0x97   :  { %91 = vst.msk [vmem:[#allocation7] sm:$0x3] %vm90_vm6, %v88_v31 }
  0x98   :  { %102 = dma.vmem_to_hbm [thread:$0]  %s98_s1, 32, %s100_s23, [#allocation4]  }
  0x99   :  { %191 = dma.done.wait [#allocation4], 32  }
  0x9a   :  { %192 = vsyncadd [#allocation4], 4294967264 }
  0x9b   :  { %107 = vsyncpa [#allocation3], 1 }
  0x9c   :  { %108 = vsyncpa [#allocation6], 1 }
  0x9d   :  { %109 = vsyncpa [#allocation4], 1 }

</bundles_post_ra>
